<compile_context>
chip_gen: v7x
topology: tpu7x:2x2x1
jax: 0.10.0
libtpu: 0.0.40
codegen_flags: <defaults>
</compile_context>

<pallas_src>
import jax
import jax.numpy as jnp
from jax.experimental import pallas as pl
from jax.experimental.pallas import tpu as pltpu

MXU_DTYPE = jnp.bfloat16  # bf16 is fine on the MXU for v5e/v6e/v7x; use jnp.float32 for exact f32.


def _conv3x3_kernel(xp_ref, w_ref, o_ref):
    """One batch element per grid step.

    xp_ref: (1, H+2, W*Cin)    H-zero-padded, lane-dense image (w-major, ci-minor).
    w_ref : (3, W*Cin, W*Cout) block-Toeplitz RHS, one per kh tap; the band
                               truncation implements the width zero-padding.
    o_ref : (1, H, W*Cout)     lane-dense output rows (matmul layout == store layout).
    """
    H = xp_ref.shape[1] - 2
    WN = o_ref.shape[2]

    acc = jnp.zeros((H, WN), jnp.float32)
    for kh in range(3):                          # static unroll: 3 MXU pushes
        lhs = xp_ref[0, kh:kh + H, :]            # (H, W*Cin) sublane-shifted slice
        acc = acc + jnp.dot(lhs, w_ref[kh], preferred_element_type=jnp.float32)
    o_ref[0] = acc.astype(o_ref.dtype)
    # TODO(synk): module's optional `act` callable and bias not implemented
    # (defaults act=False, bias=False).


def conv3x3_forward(x_nchw, w_oihw, *, out_dtype=None):
    """Forward pass of conv_layer (NCHW / OIHW API, matching the PyTorch module)."""
    N, Cin, H, W = x_nchw.shape
    Cout, Cin_w, KH, KW = w_oihw.shape
    assert (KH, KW) == (3, 3) and Cin_w == Cin
    out_dtype = out_dtype or x_nchw.dtype

    WC, WN = W * Cin, W * Cout

    # ---- input: NCHW -> lane-dense (N, H+2, W*Cin), H zero-padded, cast fused
    # into the same (single) relayout pass.
    # TODO(synk): in a real model keep activations in this lane-dense layout
    # end-to-end; the transpose only exists to honor the NCHW module API.
    x2d = jnp.transpose(x_nchw, (0, 2, 3, 1)).reshape(N, H, WC).astype(MXU_DTYPE)
    xpad = jnp.pad(x2d, ((0, 0), (1, 1), (0, 0)))

    # ---- weights: (Cout,Cin,3,3) -> 3 block-Toeplitz RHS mats (3, W*Cin, W*Cout).
    # rhs[kh, wi*Cin+ci, w*Cout+co] = W[kh, wi-w+1, ci, co] if 0 <= wi-w+1 <= 2 else 0.
    # TODO(synk): Toeplitz RHS scales as W^2*Cin*Cout and the image is whole-
    # resident per step; for large H/W switch to halo row tiling + plain im2col.
    w_hwio = jnp.transpose(w_oihw, (2, 3, 1, 0))                 # (3,3,Cin,Cout)
    wi = jnp.arange(W)
    kw_idx = wi[:, None] - wi[None, :] + 1                       # (W_in, W_out)
    valid = (kw_idx >= 0) & (kw_idx < 3)
    toep = w_hwio[:, jnp.clip(kw_idx, 0, 2), :, :]               # (3, Wi, Wo, Cin, Cout)
    toep = jnp.where(valid[None, :, :, None, None], toep, 0.0)
    toep = jnp.transpose(toep, (0, 1, 3, 2, 4))                  # (3, Wi, Cin, Wo, Cout)
    w_toep = toep.reshape(3, WC, WN).astype(MXU_DTYPE)

    # ---- VMEM budget from the actual working set (+ headroom), capped for v7x.
    it = jnp.dtype(MXU_DTYPE).itemsize
    ot = jnp.dtype(out_dtype).itemsize
    work = 2 * (H + 2) * WC * it + 2 * H * WN * ot + 3 * WC * WN * it
    vmem_limit = int(min(48 << 20, max(4 << 20, 2 * work)))

    flops = 2 * N * 3 * H * WC * WN  # actual MXU work (Toeplitz zeros included)
    bytes_accessed = int(N * (H + 2) * WC * it + 3 * WC * WN * it + N * H * WN * ot)

    out = pl.pallas_call(
        _conv3x3_kernel,
        out_shape=jax.ShapeDtypeStruct((N, H, WN), out_dtype),
        grid=(N,),
        in_specs=[
            pl.BlockSpec((1, H + 2, WC), lambda n: (n, 0, 0)),
            pl.BlockSpec((3, WC, WN), lambda n: (0, 0, 0)),
        ],
        out_specs=pl.BlockSpec((1, H, WN), lambda n: (n, 0, 0)),
        compiler_params=pltpu.CompilerParams(
            dimension_semantics=("parallel",),
            vmem_limit_bytes=vmem_limit),
        cost_estimate=pl.CostEstimate(flops=flops, transcendentals=0,
                                      bytes_accessed=bytes_accessed),
    )(xpad, w_toep)

    y = out.reshape(N, H, W, Cout)
    return jnp.transpose(y, (0, 3, 1, 2)).astype(out_dtype)


if __name__ == "__main__":
    key = jax.random.PRNGKey(0)
    kx, kw = jax.random.split(key)

    # Module config: conv_layer(in_channels=4, out_channels=8)
    N, Cin, Cout, H, W = 2, 4, 8, 16, 16

    x = jax.random.normal(kx, (N, Cin, H, W), dtype=jnp.float32)
    fan_in = Cin * 3 * 3
    bound = 1.0 / (fan_in ** 0.5)
    w = jax.random.uniform(kw, (Cout, Cin, 3, 3),
                           minval=-bound, maxval=bound, dtype=jnp.float32)

    y = jax.block_until_ready(conv3x3_forward(x, w))

    # Reference: XLA conv on the same bf16-rounded operands (the kernel runs the
    # MXU matmuls in bf16 with f32 accumulation).
    x_r = x.astype(MXU_DTYPE).astype(jnp.float32)
    w_r = w.astype(MXU_DTYPE).astype(jnp.float32)
    y_ref = jax.lax.conv_general_dilated(
        x_r, w_r, window_strides=(1, 1), padding=((1, 1), (1, 1)),
        dimension_numbers=("NCHW", "OIHW", "NCHW"))
    assert y.shape == (N, Cout, H, W)
    assert jnp.allclose(y, y_ref, atol=2e-3, rtol=2e-3), \
        float(jnp.max(jnp.abs(y - y_ref)))

    print("KERNEL_OK")
</pallas_src>

<mosaic_0001>
module attributes {stable_mosaic.version = 11 : i64} {
  func.func @_conv3x3_kernel(%arg0: i32, %arg1: memref<1x18x64xbf16, #tpu.memory_space<vmem>>, %arg2: memref<3x64x128xbf16, #tpu.memory_space<vmem>>, %arg3: memref<1x16x128xf32, #tpu.memory_space<vmem>>) attributes {dimension_semantics = [#tpu.dimension_semantics<parallel>], iteration_bounds = array<i64: 2>, scalar_prefetch = 0 : i64, scratch_operands = 0 : i64, tpu.core_type = #tpu.core_type<tc>, window_params = [{transform_indices = @transform_0, window_bounds = array<i64: 1, 18, 64>}, {pipeline_mode = #tpu.pipeline_mode<synchronous>, transform_indices = @transform_1, window_bounds = array<i64: 3, 64, 128>}, {transform_indices = @transform_2, window_bounds = array<i64: 1, 16, 128>}]} {
    %cst = arith.constant 0.000000e+00 : f32
    %0 = vector.broadcast %cst : f32 to vector<16x128xf32>
    %c0 = arith.constant 0 : index
    %c0_0 = arith.constant 0 : index
    %c0_1 = arith.constant 0 : index
    %1 = vector.load %arg1[%c0, %c0_0, %c0_1] : memref<1x18x64xbf16, #tpu.memory_space<vmem>>, vector<1x16x64xbf16>
    %2 = vector.shape_cast %1 : vector<1x16x64xbf16> to vector<16x64xbf16>
    %c0_2 = arith.constant 0 : index
    %c0_3 = arith.constant 0 : index
    %c0_4 = arith.constant 0 : index
    %3 = vector.load %arg2[%c0_2, %c0_3, %c0_4] : memref<3x64x128xbf16, #tpu.memory_space<vmem>>, vector<1x64x128xbf16>
    %4 = vector.shape_cast %3 : vector<1x64x128xbf16> to vector<64x128xbf16>
    %cst_5 = arith.constant dense<0.000000e+00> : vector<16x128xf32>
    %5 = tpu.matmul %2, %4, %cst_5 {dimension_numbers = #tpu.dot_dimension_numbers<[1], [0], [0], [1], [0, 0, 1, 1], [], []>} : vector<16x64xbf16>, vector<64x128xbf16>, vector<16x128xf32> -> vector<16x128xf32>
    %6 = arith.addf %0, %5 : vector<16x128xf32>
    %c0_6 = arith.constant 0 : index
    %c1 = arith.constant 1 : index
    %c0_7 = arith.constant 0 : index
    %7 = vector.load %arg1[%c0_6, %c1, %c0_7] : memref<1x18x64xbf16, #tpu.memory_space<vmem>>, vector<1x16x64xbf16>
    %8 = vector.shape_cast %7 : vector<1x16x64xbf16> to vector<16x64xbf16>
    %c1_8 = arith.constant 1 : index
    %c0_9 = arith.constant 0 : index
    %c0_10 = arith.constant 0 : index
    %9 = vector.load %arg2[%c1_8, %c0_9, %c0_10] : memref<3x64x128xbf16, #tpu.memory_space<vmem>>, vector<1x64x128xbf16>
    %10 = vector.shape_cast %9 : vector<1x64x128xbf16> to vector<64x128xbf16>
    %cst_11 = arith.constant dense<0.000000e+00> : vector<16x128xf32>
    %11 = tpu.matmul %8, %10, %cst_11 {dimension_numbers = #tpu.dot_dimension_numbers<[1], [0], [0], [1], [0, 0, 1, 1], [], []>} : vector<16x64xbf16>, vector<64x128xbf16>, vector<16x128xf32> -> vector<16x128xf32>
    %12 = arith.addf %6, %11 : vector<16x128xf32>
    %c0_12 = arith.constant 0 : index
    %c2 = arith.constant 2 : index
    %c0_13 = arith.constant 0 : index
    %13 = vector.load %arg1[%c0_12, %c2, %c0_13] : memref<1x18x64xbf16, #tpu.memory_space<vmem>>, vector<1x16x64xbf16>
    %14 = vector.shape_cast %13 : vector<1x16x64xbf16> to vector<16x64xbf16>
    %c2_14 = arith.constant 2 : index
    %c0_15 = arith.constant 0 : index
    %c0_16 = arith.constant 0 : index
    %15 = vector.load %arg2[%c2_14, %c0_15, %c0_16] : memref<3x64x128xbf16, #tpu.memory_space<vmem>>, vector<1x64x128xbf16>
    %16 = vector.shape_cast %15 : vector<1x64x128xbf16> to vector<64x128xbf16>
    %cst_17 = arith.constant dense<0.000000e+00> : vector<16x128xf32>
    %17 = tpu.matmul %14, %16, %cst_17 {dimension_numbers = #tpu.dot_dimension_numbers<[1], [0], [0], [1], [0, 0, 1, 1], [], []>} : vector<16x64xbf16>, vector<64x128xbf16>, vector<16x128xf32> -> vector<16x128xf32>
    %18 = arith.addf %12, %17 : vector<16x128xf32>
    %c0_18 = arith.constant 0 : index
    %c0_19 = arith.constant 0 : index
    %c0_20 = arith.constant 0 : index
    %19 = vector.load %arg3[%c0_18, %c0_19, %c0_20] : memref<1x16x128xf32, #tpu.memory_space<vmem>>, vector<1x16x128xf32>
    %20 = vector.shape_cast %19 : vector<1x16x128xf32> to vector<16x128xf32>
    %21 = vector.shape_cast %18 : vector<16x128xf32> to vector<1x16x128xf32>
    tpu.vector_store %arg3[%c0_18, %c0_19, %c0_20], %21 {strides = array<i32>} : memref<1x16x128xf32, #tpu.memory_space<vmem>>, vector<1x16x128xf32>,
    return
  }
  func.func @transform_0(%arg0: i32) -> (i32, i32, i32) {
    %c0_i32 = arith.constant 0 : i32
    %c0_i32_0 = arith.constant 0 : i32
    %c0_i32_1 = arith.constant 0 : i32
    return %arg0, %c0_i32, %c0_i32_0 : i32, i32, i32
  }
  func.func @transform_1(%arg0: i32) -> (i32, i32, i32) {
    %c0_i32 = arith.constant 0 : i32
    %c0_i32_0 = arith.constant 0 : i32
    %c0_i32_1 = arith.constant 0 : i32
    %c0_i32_2 = arith.constant 0 : i32
    return %c0_i32, %c0_i32_0, %c0_i32_1 : i32, i32, i32
  }
  func.func @transform_2(%arg0: i32) -> (i32, i32, i32) {
    %c0_i32 = arith.constant 0 : i32
    %c0_i32_0 = arith.constant 0 : i32
    %c0_i32_1 = arith.constant 0 : i32
    return %arg0, %c0_i32, %c0_i32_0 : i32, i32, i32
  }
}

</mosaic_0001>

<bundles_post_ra>
// kernel: tpu_custom_call.1
= control target key start
LH: loop header
LB: loop body
LE: loop exit
PB: predicated region body
PF: predicated region fallthrough
CT: control target
= control target key end

     0   :  { %7 = vsyncpa [#allocation3], 0  ;;  %s942_s0 = inlined_call_operand.vmem [shape: bf16[2,18,64], index: 0, kind: input, shape index: {}]   ;;  %s943_s1 = inlined_call_operand.hbm [shape: bf16[3,64,128], index: 1, kind: input, shape index: {}]   ;;  %s944_s2 = inlined_call_operand.hbm [shape: f32[2,16,128], index: 2, kind: output, shape index: {}]  }
   0x1   :  { %8 = vsyncpa [#allocation4], 0 }
   0x2   :  { %10 = vsyncpa [#allocation4 + $0x1], 0  ;;  %s792_s9 = smov 0   ;;  %s794_s10 = smov 0  }
   0x3   :  { %s796_s11 = smov 0   ;;  %s798_s12 = smov 0  }
   0x4 LB: > { %s813_s13 = sadd.s32 4294967295, %s767_s12   ;;  %s512_s14 = sadd.s32 4294967294, %s767_s12   ;;  %s767_s12 = sphi %s798_s12, %s960_s12   ;;  %s763_s11 = sphi %s796_s11, %s959_s11   ;;  %s759_s10 = sphi %s794_s10, %s958_s10   ;;  %s755_s9 = sphi %s792_s9, %s957_s9  }
   0x5   : > { %s817_s15 = sadd.s32 1, %s767_s12   ;;  %s70_s16 = sadd.s32 1, %s763_s11 }
   0x6   : > { %s67_s17 = ssub.s32 %s767_s12, %s817_s15  ;;  %p80_p0 = scmp.ne.s32.totalorder %s763_s11, %s759_s10 }
   0x7   : > { %p68_p1 = scmp.eq.s32.totalorder %s67_s17, 0  ;;  %p81_p2 = scmp.eq.s32.totalorder %s813_s13, 1 }
   0x8   : > { %p86_p3 = scmp.ne.s32.totalorder %s759_s10, %s755_s9  ;;  %p87_p4 = scmp.eq.s32.totalorder %s512_s14, 1 }
   0x9   : > { %s828_s18 = scalar_select %p68_p1, %s763_s11, %s70_s16  }
   0xa   : > { %p830_p5 = por %p81_p2, %p80_p0  ;;  %p834_p6 = por %p87_p4, %p86_p3 }
   0xb   : > { %p513_p7 = scmp.ge.s32.totalorder %s767_s12, 1  ;;  %p94_p8 = scmp.lt.s32.totalorder %s767_s12, 3 }
   0xc   : > { %s948_s19 = scalar_select %p830_p5, 1, 0 }
   0xd   : > { %s949_s20 = scalar_select %p834_p6, 1, 0 }
   0xe   : > { %p945_p9 = scmp.eq.s32.totalorder %s813_s13, 0  ;;  %p841_p10 = pnand %p513_p7, %p94_p8 }
   0xf   : > { %s769_s22 = smov [#allocation2]   ;;  %s673_s27 = scalar_lea.hbm %s943_s1, 1536 }
  0x10   : > { %s950_s21 = scalar_select %p841_p10, 1, 0 }
  0x11   : > { %s106_s23 = sshll.u32 %s769_s22, 4  ;;  %p608_p11 = pneg %p841_p10  ;;  %s107_s23 = int_to_ptr.vmem [resolvable:$true] %s106_s23 }
  0x12   : > { %p674_p13 = scmp.ne.s32.totalorder %s943_s1, %s673_s27  ;;  %p680_p3 = scmp.lt.u32.totalorder %s673_s27, %s943_s1 }
  0x13   : > { %p849_p12 = pnand %p945_p9, %p608_p11 }
  0x15   : > { %p675_p0 = pneg %p849_p12 }
  0x17   : > { %p676_p1 = pnand %p675_p0, %p674_p13 }
  0x19   : > { %p677_p2 = pneg %p676_p1 }
  0x1b   : > { %p682_p4 = pnand %p680_p3, %p677_p2 }
  0x1d   : > { %685 = shalt.err (!%p682_p4)
}
  0x1e   : > { %s686_s4 = scalar_lea.vmem %s107_s23, 1536  ;;  %p694_p9 = scmp.lt.s32.totalorder %s107_s23, %s107_s23 }
  0x1f   : > { %p687_p7 = scmp.ne.s32.totalorder %s107_s23, %s686_s4  ;;  %p695_p6 = scmp.lt.s32.totalorder %s686_s4, %s686_s4 }
  0x21   : > { %p689_p8 = pnand %p687_p7, %p675_p0  ;;  %p696_p5 = por %p695_p6, %p694_p9 }
  0x23   : > { %p690_p11 = pneg %p689_p8 }
  0x25   : > { %p697_p10 = pnand %p696_p5, %p690_p11 }
  0x27   : > { %700 = shalt.err (!%p697_p10)
}
  0x28   : > { %s770_s5 = smov 64   ;;  %s771_s6 = smov 4  }
  0x29   : > { %611 = dma.hbm_to_vmem [thread:$0]  (!%p849_p12), %s943_s1, 1536, %s107_s23, [#allocation3], %s770_s5, %s770_s5, %s771_s6  }
  0x2a   : > { %p952_p13 = scmp.ne.s32.totalorder %s950_s21, 0 }
  0x2b   : > { %p953_p1 = scmp.eq.s32.totalorder (!%p952_p13), %s813_s13, 0 }
  0x2c   : > { %130 = sbr.rel (%p952_p13) target bundleno = 317 (0x13d), region = 28 }
  0x33   : > { %746 = dma.done.wait (%p953_p1), [#allocation3], 1536   ;;  %p954_p0 = pmov %p953_p1 }
  0x34   : > { %p152_p5 = scmp.lt.s32.totalorder %s813_s13, 1  ;;  %v772_v0 = vmov 0.0   ;;  %vm773_vm0 = vmmov 0   ;;  %v658_v1 = vld [vmem:[#allocation2] sm:$0xff]   ;;  %v659_v2 = vld [vmem:[#allocation2 + $0x8] sm:$0xff]   ;;  %v660_v6 = vld [vmem:[#allocation2 + $0x10] sm:$0xff]  }
  0x35   : > { %748 = vsyncadd (%p954_p0), [#allocation3], 4294965760  ;;  %571 = vmatprep.subr.bf16.mxu0 %v772_v0  ;;  %559 = vmatprep.subr.bf16.mxu1 %v772_v0  ;;  %v662_v3 = vld [vmem:[#allocation2 + $0x20] sm:$0xff]   ;;  %v666_v7 = vld [vmem:[#allocation2 + $0x28] sm:$0xff]   ;;  %vm223_vm1 = vcmask 523264   ;;  %vm348_vm3 = vcmask 1046528  }
  0x36   : > { %579 = vmatprep.mubr.msk.bf16.mxu0 %vm773_vm0, %v772_v0  ;;  %s153_s14 = scalar_select %p152_p5, %s813_s13, 1  ;;  %567 = vmatprep.mubr.msk.bf16.mxu1 %vm773_vm0, %v772_v0  ;;  %v661_v8 = vld [vmem:[#allocation2 + $0x18] sm:$0xff]   ;;  %v668_v10 = vld [vmem:[#allocation2 + $0x30] sm:$0xff]   ;;  %v665_v15 = vld [vmem:[#allocation2 + $0x40] sm:$0xff]   ;;  %vm186_vm2 = vsmask.f32 7424 }
  0x37   : > { %572 = vmatpush3.bf16.msra.mxu0 %v658_v1  ;;  %560 = vmatpush3.bf16.msra.mxu1 %v662_v3  ;;  %v670_v16 = vld [vmem:[#allocation2 + $0x38] sm:$0xff]   ;;  %v667_v20 = vld [vmem:[#allocation2 + $0x48] sm:$0xff]   ;;  %v669_v24 = vld [vmem:[#allocation2 + $0x50] sm:$0xff]   ;;  %s149_s23 = sand.u32 1, %s759_s10   ;;  %s543_s27 = sshll.u32 %s813_s13, 8 }
  0x38   : > { %s601_s16 = smul.u32 12, %s153_s14  ;;  %573 = vmatprep.subr.bf16.mxu0 %v772_v0  ;;  %561 = vmatprep.subr.bf16.mxu1 %v772_v0  ;;  %v672_v26 = vld [vmem:[#allocation2 + $0x58] sm:$0xff]   ;;  %s518_s24 = sshll.u32 %s149_s23, 4 }
  0x39   : > { %s151_s25 = scalar_lea.vmem [#allocation5], %s518_s24  ;;  %s899_s30 = scalar_lea.hbm %s944_s2, %s543_s27 }
  0x3a   : > { %s882_s22 = scalar_lea.vmem %s942_s0, %s601_s16  ;;  %s438_s26 = sshll.u32 %s151_s25, 4  ;;  %s894_s26 = int_to_ptr.vmem [resolvable:$true] %s438_s26 }
  0x3b   : > { %v158_v4 = vld [vmem:[%s882_s22] sm:$0xf]  ;;  %v159_v5 = vld [vmem:[%s882_s22 + $0x4] sm:$0xf]  ;;  %574 = vmatpush3.bf16.msra.mxu0 %v659_v2  ;;  %562 = vmatpush3.bf16.msra.mxu1 %v666_v7  ;;  %s901_s3 = scalar_lea.sflag [#allocation4], %s149_s23  ;;  %s701_s13 = scalar_lea.vmem %s894_s26, 256 }
  0x3c   : > { %575 = vmatprep.subr.bf16.mxu0 %v772_v0  ;;  %v520_v9 = vcombine.low %v158_v4, %v159_v5  ;;  %563 = vmatprep.subr.bf16.mxu1 %v772_v0  ;;  %v671_v13 = vld [vmem:[%s882_s22 + $0x8] ss:$0 sps:$4 sm:$0x11]   ;;  %v335_v22 = vld [vmem:[%s882_s22] sm:$0xe]  ;;  %p702_p6 = scmp.ne.s32.totalorder %s894_s26, %s701_s13  ;;  %p955_p9 = scmp.ne.s32.totalorder %s948_s19, 0 }
  0x3d   : > { %v195_v18 = vshll.u32 %v671_v13, 16  ;;  %v532_v23 = vcombine.low %v335_v22, %v159_v5  ;;  %v350_v27 = vrot.slane %v671_v13, 1  ;;  %s774_s4 = smov [#allocation5]  }
  0x3e   : > { %v188_v11 = vshrl.u32 %v520_v9, 16  ;;  %v190_v12 = vshll.u32 %v520_v9, 16  ;;  %p703_p10 = pnand %p702_p6, %p955_p9  ;;  %s705_s5 = sshll.u32 %s774_s4, 4  ;;  %s706_s5 = int_to_ptr.vmem [resolvable:$false] %s705_s5 }
  0x3f   : > { %576 = vmatpush3.bf16.msra.mxu0 %v660_v6  ;;  %564 = vmatpush3.bf16.msra.mxu1 %v668_v10  ;;  %v197_v19 = vrot.slane %v195_v18, 1  ;;  %v349_v25 = vrot.slane %v532_v23, 1  ;;  %s707_s6 = scalar_lea.vmem %s706_s5, 512  ;;  %p708_p2 = scmp.lt.s32.totalorder %s894_s26, %s706_s5 }
  0x40   : > { %577 = vmatprep.subr.bf16.mxu0 %v772_v0  ;;  %v192_v14 = vrot.slane %v190_v12, 1  ;;  %565 = vmatprep.subr.bf16.mxu1 %v772_v0  ;;  %p704_p12 = pneg %p703_p10  ;;  %p709_p3 = scmp.lt.s32.totalorder %s707_s6, %s701_s13 }
  0x41   : > { %v351_v28 = vsel %vm348_vm3, %v349_v25, %v350_v27 }
  0x42   : > { %v193_v17 = vor.u32 %v192_v14, %v188_v11  ;;  %p710_p4 = por %p709_p3, %p708_p2 }
  0x43   : > { %578 = vmatpush3.bf16.msra.mxu0 %v661_v8  ;;  %566 = vmatpush3.bf16.msra.mxu1 %v670_v16 }
  0x44   : > { %583 = vmatprep.subr.bf16.mxu0 %v772_v0  ;;  %v198_v21 = vsel %vm186_vm2, %v193_v17, %v197_v19  ;;  %p711_p7 = pnand %p710_p4, %p704_p12 }
  0x46   : > { %580 = vmatmul.mubr.msk.bf16.vlgmr.msra.gmra.mrb[0].mxu0 %vm223_vm1, %v520_v9  ;;  %568 = vmatmul.mubr.msk.bf16.vlgmr.msra.gmra.mrb[0].mxu1 %vm223_vm1, %v198_v21 }
  0x47   : > { %584 = vmatpush3.bf16.msra.mxu0 %v665_v15  ;;  %591 = vmatprep.mubr.msk.bf16.mxu0 %vm773_vm0, %v772_v0 }
  0x48   : > { %585 = vmatprep.subr.bf16.mxu0 %v772_v0 }
  0x4b   : > { %586 = vmatpush3.bf16.msra.mxu0 %v667_v20 }
  0x4c   : > { %587 = vmatprep.subr.bf16.mxu0 %v772_v0 }
  0x4f   : > { %588 = vmatpush3.bf16.msra.mxu0 %v669_v24 }
  0x50   : > { %589 = vmatprep.subr.bf16.mxu0 %v772_v0 }
  0x53   : > { %590 = vmatpush3.bf16.msra.mxu0 %v672_v26 }
  0x56   : > { %592 = vmatmul.mubr.msk.bf16.vlgmr.msra.gmra.mrb[0].mxu0 %vm223_vm1, %v351_v28 }
 0x119   : > { %v261_v29 = vpop.f32.mrb[0].mxu1 }
 0x11a   : > { %v569_v30 = vpop.f32.mrb[1].mxu1 }
 0x11b   : > { %v264_v31 = vpop.f32.mrb[2].mxu1 }
 0x11c   : > { %v570_v32 = vpop.f32.mrb[3].mxu1 }
 0x129   : > { %v413_v33 = vpop.f32.mrb[0].mxu0 }
 0x12a   : > { %v595_v34 = vadd.f32 %v413_v33, %v261_v29  ;;  %v593_v35 = vpop.f32.mrb[1].mxu0 }
 0x12b   : > { %v416_v36 = vpop.f32.mrb[2].mxu0 }
 0x12c   : > { %422 = vst [vmem:[%s151_s25] sm:$0xff] %v595_v34  ;;  %v596_v37 = vadd.f32 %v416_v36, %v264_v31  ;;  %v594_v38 = vpop.f32.mrb[3].mxu0 }
 0x12e   : > { %423 = vst [vmem:[%s151_s25 + $0x8] sm:$0xff] %v596_v37 }
 0x12f   : > { %714 = shalt.err (!%p711_p7)
}
 0x130   : > { %s715_s7 = scalar_lea.hbm %s899_s30, 256  ;;  %s719_s16 = scalar_lea.hbm %s944_s2, 512 }
 0x131   : > { %p716_p8 = scmp.ne.s32.totalorder %s899_s30, %s715_s7  ;;  %p720_p1 = scmp.lt.u32.totalorder %s899_s30, %s944_s2 }
 0x132   : > { %p721_p0 = scmp.lt.u32.totalorder %s719_s16, %s715_s7  ;;  %p723_p6 = scmp.lt.u32.totalorder %s715_s7, %s899_s30 }
 0x133   : > { %p717_p11 = pnand %p716_p8, %p955_p9 }
 0x134   : > { %p722_p5 = por %p721_p0, %p720_p1 }
 0x135   : > { %p718_p13 = pneg %p717_p11 }
 0x136   : > { %p724_p10 = por %p723_p6, %p722_p5 }
 0x138   : > { %p725_p12 = pnand %p724_p10, %p718_p13 }
 0x13a   : > { %728 = shalt.err (!%p725_p12)
}
 0x13b   : > { %s775_s22 = smov 128   ;;  %s776_s23 = smov 8  }
 0x13c   : > { %606 = dma.vmem_to_hbm [thread:$0]  (%p955_p9), %s894_s26, 256, %s899_s30, %s901_s3, %s775_s22, %s775_s22, %s776_s23  }
 0x13d PF: > { %p618_p2 = scmp.ge.s32.totalorder %s767_s12, 2  ;;  %s453_s24 = sand.u32 1, %s755_s9  }
 0x13e   : > { %p956_p3 = scmp.ne.s32.totalorder %s949_s20, 0  ;;  %s454_s25 = scalar_lea.sflag [#allocation4], %s453_s24 }
 0x140   : > { %p613_p4 = pnand %p618_p2, %p956_p3 }
 0x142   : > { %750 = dma.done.wait (!%p613_p4), %s454_s25, 256  }
 0x143   : > { %752 = vsyncadd (!%p613_p4), %s454_s25, 4294967040  ;;  %p13_p7 = scmp.ge.s32.totalorder %s817_s15, 4   ;;  %s957_s9 = smov %s759_s10 }
 0x144   : > { %s958_s10 = smov %s763_s11  ;;  %s959_s11 = smov %s828_s18 }
 0x145   : > { %s960_s12 = smov %s817_s15  ;;  %15 = sbr.rel (!%p13_p7) target bundleno = 4 (0x4), region = 70 }
 0x14c   :  { %459 = vsyncpa [#allocation3], 1 }
 0x14d   :  { %461 = vsyncpa [#allocation3 + $0x1], 1 }
 0x14e   :  { %462 = vsyncpa [#allocation4], 1 }
 0x14f   :  { %464 = vsyncpa [#allocation4 + $0x1], 1 }

</bundles_post_ra>
